<compile_context>
chip_gen: v7x
topology: tpu7x:2x2x1
jax: 0.10.0
libtpu: 0.0.40
codegen_flags: <defaults>
</compile_context>

<pallas_src>
import functools

import jax
import jax.numpy as jnp
from jax import lax
from jax.experimental import pallas as pl
from jax.experimental.pallas import tpu as pltpu


# --------------------- Fused LayerNorm + Conv3x3 + SiLU kernel ----------------------
def _fused_ln_conv_silu_kernel(x_ref, g_ref, b_ref, w_ref, bias_ref, o_ref,
                               xpad_ref, slab_ref, *, W, eps, normalize):
    # x_ref:    (1, C, HW)      lane-dense input block (one batch element)
    # g_ref/b_ref: (C, HW)      LayerNorm affine params
    # w_ref:    (out_c, 9*C)    conv weights, column order (dy, dx, c)
    # bias_ref: (out_c, 1)
    # o_ref:    (1, out_c, HW)
    # xpad_ref: (C, HW + 2*(W+1)) scratch: zero-padded flat image
    # slab_ref: (9*C, HW)       scratch: im2col slab
    C, HW = x_ref.shape[1], x_ref.shape[2]
    pad = W + 1

    # ---- LayerNorm over all (C, H, W) elements, f32 stats (== nn.LayerNorm((C,H,W)))
    x = x_ref[0].astype(jnp.float32)                          # (C, HW)
    if normalize:
        mean = jnp.mean(x, keepdims=True)                     # (1, 1)
        var = jnp.mean((x - mean) ** 2, keepdims=True)        # biased var (PyTorch LN)
        inv = lax.rsqrt(var + eps)
        xn = (x - mean) * inv * g_ref[...].astype(jnp.float32) \
             + b_ref[...].astype(jnp.float32)
    else:
        xn = x

    # ---- Zero-padded flat image per channel: [pad zeros | xn (HW) | pad zeros].
    # A shift by (dy, dx) is then a static slice at offset pad + dy*W + dx; rows that
    # fall outside [0, H) land in the zero regions automatically, columns that fall
    # outside [0, W) are masked below.
    xpad_ref[...] = jnp.zeros_like(xpad_ref)
    xpad_ref[:, pad:pad + HW] = xn.astype(xpad_ref.dtype)

    # Column index of each flattened pixel (for the conv's zero padding along W).
    col = lax.broadcasted_iota(jnp.int32, (1, HW), 1) % W
    col_masks = (col >= 1, None, col <= W - 2)                # dx = -1, 0, +1

    # ---- Build the im2col slab in VMEM: row block k = offset (dy, dx).
    # Matches w_ref column order conv_w.transpose(0, 2, 3, 1).reshape(out_c, 9*C).
    for k in range(9):
        dy, dx = k // 3 - 1, k % 3 - 1
        off = dy * W + dx
        piece = xpad_ref[:, pad + off: pad + off + HW]        # (C, HW) static slice
        mask = col_masks[dx + 1]
        if mask is not None:
            piece = jnp.where(mask, piece, jnp.zeros_like(piece))
        slab_ref[k * C:(k + 1) * C, :] = piece

    # ---- Conv as one MXU matmul + bias + SiLU epilogue (f32 accumulation).
    acc = jnp.dot(w_ref[...], slab_ref[...], preferred_element_type=jnp.float32)
    acc = acc + bias_ref[...].astype(jnp.float32)             # (out_c, HW)
    out = acc * jax.nn.sigmoid(acc)                           # SiLU (stable)
    o_ref[0] = out.astype(o_ref.dtype)


def my_conv_forward(x, ln_gamma, ln_beta, conv_w, conv_b, *, normalize=True, eps=1e-5):
    """Equivalent of MyConv.forward for kernel_size=3, stride=1, padding=1."""
    N, C, H, W = x.shape
    out_c, in_c, kh, kw = conv_w.shape
    assert in_c == C and (kh, kw) == (3, 3), "kernel assumes 3x3 conv, stride 1, padding 1"
    HW = H * W

    # Lane-dense layouts (minor dim = H*W, a multiple of 128 here). These reshapes
    # are contiguous (no data movement in XLA).
    x2 = x.reshape(N, C, HW)
    g2 = ln_gamma.reshape(C, HW)
    b2 = ln_beta.reshape(C, HW)
    # Weight columns ordered (dy, dx, c) to match the slab built inside the kernel.
    w2 = conv_w.transpose(0, 2, 3, 1).reshape(out_c, 9 * C)
    bias2 = conv_b.reshape(out_c, 1)

    kernel = functools.partial(_fused_ln_conv_silu_kernel,
                               W=W, eps=eps, normalize=normalize)

    y = pl.pallas_call(
        kernel,
        out_shape=jax.ShapeDtypeStruct((N, out_c, HW), x.dtype),
        grid=(N,),
        in_specs=[
            pl.BlockSpec((1, C, HW), lambda n: (n, 0, 0)),      # x (per batch)
            pl.BlockSpec((C, HW), lambda n: (0, 0)),            # gamma
            pl.BlockSpec((C, HW), lambda n: (0, 0)),            # beta
            pl.BlockSpec((out_c, 9 * C), lambda n: (0, 0)),     # conv weights
            pl.BlockSpec((out_c, 1), lambda n: (0, 0)),         # conv bias
        ],
        out_specs=pl.BlockSpec((1, out_c, HW), lambda n: (n, 0, 0)),
        scratch_shapes=[
            pltpu.VMEM((C, HW + 2 * (W + 1)), x.dtype),         # zero-padded flat image
            pltpu.VMEM((9 * C, HW), x.dtype),                   # im2col slab
        ],
        compiler_params=pltpu.CompilerParams(
            dimension_semantics=("parallel",),                  # batch steps -> both TCs on v7x
        ),
    )(x2, g2, b2, w2, bias2)
    return y.reshape(N, out_c, H, W)


# ------------------------------ Pure-JAX reference ----------------------------------
def _reference(x, ln_gamma, ln_beta, conv_w, conv_b, eps=1e-5):
    mean = jnp.mean(x, axis=(1, 2, 3), keepdims=True)
    var = jnp.mean((x - mean) ** 2, axis=(1, 2, 3), keepdims=True)
    xn = (x - mean) * lax.rsqrt(var + eps) * ln_gamma[None] + ln_beta[None]
    y = lax.conv_general_dilated(
        xn, conv_w, window_strides=(1, 1), padding=((1, 1), (1, 1)),
        dimension_numbers=("NCHW", "OIHW", "NCHW"))
    y = y + conv_b[None, :, None, None]
    return y * jax.nn.sigmoid(y)


if __name__ == "__main__":
    # Small deterministic shapes: batch=2, in_c=4, out_c=8, spatial=16x16.
    N, C, H, W, OUT_C = 2, 4, 16, 16, 8

    key = jax.random.PRNGKey(0)
    kx, kg, kb, kw, kc = jax.random.split(key, 5)
    x = jax.random.normal(kx, (N, C, H, W), dtype=jnp.float32)
    ln_gamma = 1.0 + 0.1 * jax.random.normal(kg, (C, H, W), dtype=jnp.float32)
    ln_beta = 0.1 * jax.random.normal(kb, (C, H, W), dtype=jnp.float32)
    conv_w = 0.1 * jax.random.normal(kw, (OUT_C, C, 3, 3), dtype=jnp.float32)
    conv_b = 0.1 * jax.random.normal(kc, (OUT_C,), dtype=jnp.float32)

    out = my_conv_forward(x, ln_gamma, ln_beta, conv_w, conv_b, normalize=True)
    out = jax.block_until_ready(out)

    ref = _reference(x, ln_gamma, ln_beta, conv_w, conv_b)
    max_err = float(jnp.max(jnp.abs(out - ref)))
    assert out.shape == (N, OUT_C, H, W), out.shape
    assert max_err < 2e-4, f"mismatch vs reference: {max_err}"

    print("KERNEL_OK")
</pallas_src>

<mosaic_0001>
module attributes {stable_mosaic.version = 11 : i64} {
  func.func @_fused_ln_conv_silu_kernel(%arg0: i32, %arg1: memref<1x4x256xf32, #tpu.memory_space<vmem>>, %arg2: memref<4x256xf32, #tpu.memory_space<vmem>>, %arg3: memref<4x256xf32, #tpu.memory_space<vmem>>, %arg4: memref<8x36xf32, #tpu.memory_space<vmem>>, %arg5: memref<8x1xf32, #tpu.memory_space<vmem>>, %arg6: memref<1x8x256xf32, #tpu.memory_space<vmem>>, %arg7: memref<4x290xf32, #tpu.memory_space<vmem>>, %arg8: memref<36x256xf32, #tpu.memory_space<vmem>>) attributes {dimension_semantics = [#tpu.dimension_semantics<parallel>], iteration_bounds = array<i64: 2>, scalar_prefetch = 0 : i64, scratch_operands = 2 : i64, tpu.core_type = #tpu.core_type<tc>, window_params = [{transform_indices = @transform_0, window_bounds = array<i64: 1, 4, 256>}, {pipeline_mode = #tpu.pipeline_mode<synchronous>, transform_indices = @transform_1, window_bounds = array<i64: 4, 256>}, {pipeline_mode = #tpu.pipeline_mode<synchronous>, transform_indices = @transform_2, window_bounds = array<i64: 4, 256>}, {pipeline_mode = #tpu.pipeline_mode<synchronous>, transform_indices = @transform_3, window_bounds = array<i64: 8, 36>}, {pipeline_mode = #tpu.pipeline_mode<synchronous>, transform_indices = @transform_4, window_bounds = array<i64: 8, 1>}, {transform_indices = @transform_5, window_bounds = array<i64: 1, 8, 256>}]} {
    %c0 = arith.constant 0 : index
    %c0_0 = arith.constant 0 : index
    %c0_1 = arith.constant 0 : index
    %0 = vector.load %arg1[%c0, %c0_0, %c0_1] : memref<1x4x256xf32, #tpu.memory_space<vmem>>, vector<1x4x256xf32>
    %1 = vector.shape_cast %0 : vector<1x4x256xf32> to vector<4x256xf32>
    %2 = vector.shape_cast %1 : vector<4x256xf32> to vector<1x4x256xf32>
    %cst = arith.constant dense<0.000000e+00> : vector<1xf32>
    %3 = vector.multi_reduction <add>, %2, %cst [1, 2] : vector<1x4x256xf32> to vector<1xf32>
    %4 = vector.shape_cast %3 : vector<1xf32> to vector<1x1x1xf32>
    %5 = vector.extract %4[0, 0, 0] : f32 from vector<1x1x1xf32>
    %6 = vector.broadcast %5 : f32 to vector<1x1xf32>
    %cst_2 = arith.constant 1.024000e+03 : f32
    %7 = vector.broadcast %cst_2 : f32 to vector<1x1xf32>
    %8 = arith.divf %6, %7 : vector<1x1xf32>
    %9 = vector.broadcast %8 : vector<1x1xf32> to vector<4x256xf32>
    %10 = arith.subf %1, %9 : vector<4x256xf32>
    %11 = arith.mulf %10, %10 : vector<4x256xf32>
    %12 = vector.shape_cast %11 : vector<4x256xf32> to vector<1x4x256xf32>
    %cst_3 = arith.constant dense<0.000000e+00> : vector<1xf32>
    %13 = vector.multi_reduction <add>, %12, %cst_3 [1, 2] : vector<1x4x256xf32> to vector<1xf32>
    %14 = vector.shape_cast %13 : vector<1xf32> to vector<1x1x1xf32>
    %15 = vector.extract %14[0, 0, 0] : f32 from vector<1x1x1xf32>
    %16 = vector.broadcast %15 : f32 to vector<1x1xf32>
    %cst_4 = arith.constant 1.024000e+03 : f32
    %17 = vector.broadcast %cst_4 : f32 to vector<1x1xf32>
    %18 = arith.divf %16, %17 : vector<1x1xf32>
    %cst_5 = arith.constant 9.99999974E-6 : f32
    %19 = vector.broadcast %cst_5 : f32 to vector<1x1xf32>
    %20 = arith.addf %18, %19 : vector<1x1xf32>
    %21 = math.rsqrt %20 : vector<1x1xf32>
    %22 = vector.broadcast %8 : vector<1x1xf32> to vector<4x256xf32>
    %23 = arith.subf %1, %22 : vector<4x256xf32>
    %24 = vector.broadcast %21 : vector<1x1xf32> to vector<4x256xf32>
    %25 = arith.mulf %23, %24 : vector<4x256xf32>
    %c0_6 = arith.constant 0 : index
    %c0_7 = arith.constant 0 : index
    %26 = vector.load %arg2[%c0_6, %c0_7] : memref<4x256xf32, #tpu.memory_space<vmem>>, vector<4x256xf32>
    %27 = arith.mulf %25, %26 : vector<4x256xf32>
    %c0_8 = arith.constant 0 : index
    %c0_9 = arith.constant 0 : index
    %28 = vector.load %arg3[%c0_8, %c0_9] : memref<4x256xf32, #tpu.memory_space<vmem>>, vector<4x256xf32>
    %29 = arith.addf %27, %28 : vector<4x256xf32>
    %cst_10 = arith.constant 0.000000e+00 : f32
    %30 = vector.broadcast %cst_10 : f32 to vector<4x290xf32>
    %c0_11 = arith.constant 0 : index
    %c0_12 = arith.constant 0 : index
    %31 = vector.load %arg7[%c0_11, %c0_12] : memref<4x290xf32, #tpu.memory_space<vmem>>, vector<4x290xf32>
    tpu.vector_store %arg7[%c0_11, %c0_12], %30 {strides = array<i32>} : memref<4x290xf32, #tpu.memory_space<vmem>>, vector<4x290xf32>,
    %c0_13 = arith.constant 0 : index
    %c17 = arith.constant 17 : index
    %32 = vector.load %arg7[%c0_13, %c17] : memref<4x290xf32, #tpu.memory_space<vmem>>, vector<4x256xf32>
    tpu.vector_store %arg7[%c0_13, %c17], %29 {strides = array<i32>} : memref<4x290xf32, #tpu.memory_space<vmem>>, vector<4x256xf32>,
    %33 = tpu.iota {dimensions = array<i32: 1>} : vector<1x256xi32>
    %c16_i32 = arith.constant 16 : i32
    %c0_i32 = arith.constant 0 : i32
    %34 = arith.cmpi eq, %c16_i32, %c0_i32 : i32
    %c1_i32 = arith.constant 1 : i32
    %35 = arith.select %34, %c1_i32, %c16_i32 : i32
    %36 = vector.broadcast %35 : i32 to vector<1x256xi32>
    %37 = arith.remsi %33, %36 : vector<1x256xi32>
    %c0_i32_14 = arith.constant 0 : i32
    %38 = vector.broadcast %c0_i32_14 : i32 to vector<1x256xi32>
    %39 = arith.cmpi ne, %37, %38 : vector<1x256xi32>
    %c0_i32_15 = arith.constant 0 : i32
    %40 = vector.broadcast %c0_i32_15 : i32 to vector<1x256xi32>
    %41 = arith.cmpi slt, %37, %40 : vector<1x256xi32>
    %c0_i32_16 = arith.constant 0 : i32
    %42 = arith.cmpi slt, %35, %c0_i32_16 : i32
    %43 = vector.broadcast %42 : i1 to vector<1x256xi1>
    %44 = vector.broadcast %43 : vector<1x256xi1> to vector<1x256xi1>
    %45 = arith.xori %41, %44 : vector<1x256xi1>
    %46 = arith.andi %45, %39 : vector<1x256xi1>
    %47 = vector.broadcast %35 : i32 to vector<1x256xi32>
    %48 = arith.addi %37, %47 : vector<1x256xi32>
    %49 = arith.select %46, %48, %37 : vector<1x256xi1>, vector<1x256xi32>
    %c1_i32_17 = arith.constant 1 : i32
    %50 = vector.broadcast %c1_i32_17 : i32 to vector<1x256xi32>
    %51 = arith.cmpi sge, %49, %50 : vector<1x256xi32>
    %c14_i32 = arith.constant 14 : i32
    %52 = vector.broadcast %c14_i32 : i32 to vector<1x256xi32>
    %53 = arith.cmpi sle, %49, %52 : vector<1x256xi32>
    %c0_18 = arith.constant 0 : index
    %c0_19 = arith.constant 0 : index
    %54 = vector.load %arg7[%c0_18, %c0_19] : memref<4x290xf32, #tpu.memory_space<vmem>>, vector<4x256xf32>
    %cst_20 = arith.constant 0.000000e+00 : f32
    %55 = vector.broadcast %cst_20 : f32 to vector<4x256xf32>
    %56 = vector.shape_cast %51 : vector<1x256xi1> to vector<1x256xi1>
    %57 = vector.broadcast %56 : vector<1x256xi1> to vector<4x256xi1>
    %58 = arith.select %57, %54, %55 : vector<4x256xi1>, vector<4x256xf32>
    %c0_21 = arith.constant 0 : index
    %c0_22 = arith.constant 0 : index
    %59 = vector.load %arg8[%c0_21, %c0_22] : memref<36x256xf32, #tpu.memory_space<vmem>>, vector<4x256xf32>
    tpu.vector_store %arg8[%c0_21, %c0_22], %58 {strides = array<i32>} : memref<36x256xf32, #tpu.memory_space<vmem>>, vector<4x256xf32>,
    %c0_23 = arith.constant 0 : index
    %c1 = arith.constant 1 : index
    %60 = vector.load %arg7[%c0_23, %c1] : memref<4x290xf32, #tpu.memory_space<vmem>>, vector<4x256xf32>
    %c4 = arith.constant 4 : index
    %c0_24 = arith.constant 0 : index
    %61 = vector.load %arg8[%c4, %c0_24] : memref<36x256xf32, #tpu.memory_space<vmem>>, vector<4x256xf32>
    tpu.vector_store %arg8[%c4, %c0_24], %60 {strides = array<i32>} : memref<36x256xf32, #tpu.memory_space<vmem>>, vector<4x256xf32>,
    %c0_25 = arith.constant 0 : index
    %c2 = arith.constant 2 : index
    %62 = vector.load %arg7[%c0_25, %c2] : memref<4x290xf32, #tpu.memory_space<vmem>>, vector<4x256xf32>
    %cst_26 = arith.constant 0.000000e+00 : f32
    %63 = vector.broadcast %cst_26 : f32 to vector<4x256xf32>
    %64 = vector.shape_cast %53 : vector<1x256xi1> to vector<1x256xi1>
    %65 = vector.broadcast %64 : vector<1x256xi1> to vector<4x256xi1>
    %66 = arith.select %65, %62, %63 : vector<4x256xi1>, vector<4x256xf32>
    %c8 = arith.constant 8 : index
    %c0_27 = arith.constant 0 : index
    %67 = vector.load %arg8[%c8, %c0_27] : memref<36x256xf32, #tpu.memory_space<vmem>>, vector<4x256xf32>
    tpu.vector_store %arg8[%c8, %c0_27], %66 {strides = array<i32>} : memref<36x256xf32, #tpu.memory_space<vmem>>, vector<4x256xf32>,
    %c0_28 = arith.constant 0 : index
    %c16 = arith.constant 16 : index
    %68 = vector.load %arg7[%c0_28, %c16] : memref<4x290xf32, #tpu.memory_space<vmem>>, vector<4x256xf32>
    %cst_29 = arith.constant 0.000000e+00 : f32
    %69 = vector.broadcast %cst_29 : f32 to vector<4x256xf32>
    %70 = vector.shape_cast %51 : vector<1x256xi1> to vector<1x256xi1>
    %71 = vector.broadcast %70 : vector<1x256xi1> to vector<4x256xi1>
    %72 = arith.select %71, %68, %69 : vector<4x256xi1>, vector<4x256xf32>
    %c12 = arith.constant 12 : index
    %c0_30 = arith.constant 0 : index
    %73 = vector.load %arg8[%c12, %c0_30] : memref<36x256xf32, #tpu.memory_space<vmem>>, vector<4x256xf32>
    tpu.vector_store %arg8[%c12, %c0_30], %72 {strides = array<i32>} : memref<36x256xf32, #tpu.memory_space<vmem>>, vector<4x256xf32>,
    %c0_31 = arith.constant 0 : index
    %c17_32 = arith.constant 17 : index
    %74 = vector.load %arg7[%c0_31, %c17_32] : memref<4x290xf32, #tpu.memory_space<vmem>>, vector<4x256xf32>
    %c16_33 = arith.constant 16 : index
    %c0_34 = arith.constant 0 : index
    %75 = vector.load %arg8[%c16_33, %c0_34] : memref<36x256xf32, #tpu.memory_space<vmem>>, vector<4x256xf32>
    tpu.vector_store %arg8[%c16_33, %c0_34], %74 {strides = array<i32>} : memref<36x256xf32, #tpu.memory_space<vmem>>, vector<4x256xf32>,
    %c0_35 = arith.constant 0 : index
    %c18 = arith.constant 18 : index
    %76 = vector.load %arg7[%c0_35, %c18] : memref<4x290xf32, #tpu.memory_space<vmem>>, vector<4x256xf32>
    %cst_36 = arith.constant 0.000000e+00 : f32
    %77 = vector.broadcast %cst_36 : f32 to vector<4x256xf32>
    %78 = vector.shape_cast %53 : vector<1x256xi1> to vector<1x256xi1>
    %79 = vector.broadcast %78 : vector<1x256xi1> to vector<4x256xi1>
    %80 = arith.select %79, %76, %77 : vector<4x256xi1>, vector<4x256xf32>
    %c20 = arith.constant 20 : index
    %c0_37 = arith.constant 0 : index
    %81 = vector.load %arg8[%c20, %c0_37] : memref<36x256xf32, #tpu.memory_space<vmem>>, vector<4x256xf32>
    tpu.vector_store %arg8[%c20, %c0_37], %80 {strides = array<i32>} : memref<36x256xf32, #tpu.memory_space<vmem>>, vector<4x256xf32>,
    %c0_38 = arith.constant 0 : index
    %c32 = arith.constant 32 : index
    %82 = vector.load %arg7[%c0_38, %c32] : memref<4x290xf32, #tpu.memory_space<vmem>>, vector<4x256xf32>
    %cst_39 = arith.constant 0.000000e+00 : f32
    %83 = vector.broadcast %cst_39 : f32 to vector<4x256xf32>
    %84 = vector.shape_cast %51 : vector<1x256xi1> to vector<1x256xi1>
    %85 = vector.broadcast %84 : vector<1x256xi1> to vector<4x256xi1>
    %86 = arith.select %85, %82, %83 : vector<4x256xi1>, vector<4x256xf32>
    %c24 = arith.constant 24 : index
    %c0_40 = arith.constant 0 : index
    %87 = vector.load %arg8[%c24, %c0_40] : memref<36x256xf32, #tpu.memory_space<vmem>>, vector<4x256xf32>
    tpu.vector_store %arg8[%c24, %c0_40], %86 {strides = array<i32>} : memref<36x256xf32, #tpu.memory_space<vmem>>, vector<4x256xf32>,
    %c0_41 = arith.constant 0 : index
    %c33 = arith.constant 33 : index
    %88 = vector.load %arg7[%c0_41, %c33] : memref<4x290xf32, #tpu.memory_space<vmem>>, vector<4x256xf32>
    %c28 = arith.constant 28 : index
    %c0_42 = arith.constant 0 : index
    %89 = vector.load %arg8[%c28, %c0_42] : memref<36x256xf32, #tpu.memory_space<vmem>>, vector<4x256xf32>
    tpu.vector_store %arg8[%c28, %c0_42], %88 {strides = array<i32>} : memref<36x256xf32, #tpu.memory_space<vmem>>, vector<4x256xf32>,
    %c0_43 = arith.constant 0 : index
    %c34 = arith.constant 34 : index
    %90 = vector.load %arg7[%c0_43, %c34] : memref<4x290xf32, #tpu.memory_space<vmem>>, vector<4x256xf32>
    %cst_44 = arith.constant 0.000000e+00 : f32
    %91 = vector.broadcast %cst_44 : f32 to vector<4x256xf32>
    %92 = vector.shape_cast %53 : vector<1x256xi1> to vector<1x256xi1>
    %93 = vector.broadcast %92 : vector<1x256xi1> to vector<4x256xi1>
    %94 = arith.select %93, %90, %91 : vector<4x256xi1>, vector<4x256xf32>
    %c32_45 = arith.constant 32 : index
    %c0_46 = arith.constant 0 : index
    %95 = vector.load %arg8[%c32_45, %c0_46] : memref<36x256xf32, #tpu.memory_space<vmem>>, vector<4x256xf32>
    tpu.vector_store %arg8[%c32_45, %c0_46], %94 {strides = array<i32>} : memref<36x256xf32, #tpu.memory_space<vmem>>, vector<4x256xf32>,
    %c0_47 = arith.constant 0 : index
    %c0_48 = arith.constant 0 : index
    %96 = vector.load %arg4[%c0_47, %c0_48] : memref<8x36xf32, #tpu.memory_space<vmem>>, vector<8x36xf32>
    %c0_49 = arith.constant 0 : index
    %c0_50 = arith.constant 0 : index
    %97 = vector.load %arg8[%c0_49, %c0_50] : memref<36x256xf32, #tpu.memory_space<vmem>>, vector<36x256xf32>
    %cst_51 = arith.constant dense<0.000000e+00> : vector<8x256xf32>
    %98 = tpu.matmul %96, %97, %cst_51 {dimension_numbers = #tpu.dot_dimension_numbers<[1], [0], [0], [1], [0, 0, 1, 1], [], []>} : vector<8x36xf32>, vector<36x256xf32>, vector<8x256xf32> -> vector<8x256xf32>
    %c0_52 = arith.constant 0 : index
    %c0_53 = arith.constant 0 : index
    %99 = vector.load %arg5[%c0_52, %c0_53] : memref<8x1xf32, #tpu.memory_space<vmem>>, vector<8x1xf32>
    %100 = vector.broadcast %99 : vector<8x1xf32> to vector<8x256xf32>
    %101 = arith.addf %98, %100 : vector<8x256xf32>
    %102 = arith.negf %101 : vector<8x256xf32>
    %103 = math.exp %102 : vector<8x256xf32>
    %cst_54 = arith.constant 1.000000e+00 : f32
    %104 = vector.broadcast %cst_54 : f32 to vector<8x256xf32>
    %105 = arith.addf %104, %103 : vector<8x256xf32>
    %106 = arith.divf %104, %105 : vector<8x256xf32>
    %107 = arith.mulf %101, %106 : vector<8x256xf32>
    %c0_55 = arith.constant 0 : index
    %c0_56 = arith.constant 0 : index
    %c0_57 = arith.constant 0 : index
    %108 = vector.load %arg6[%c0_55, %c0_56, %c0_57] : memref<1x8x256xf32, #tpu.memory_space<vmem>>, vector<1x8x256xf32>
    %109 = vector.shape_cast %108 : vector<1x8x256xf32> to vector<8x256xf32>
    %110 = vector.shape_cast %107 : vector<8x256xf32> to vector<1x8x256xf32>
    tpu.vector_store %arg6[%c0_55, %c0_56, %c0_57], %110 {strides = array<i32>} : memref<1x8x256xf32, #tpu.memory_space<vmem>>, vector<1x8x256xf32>,
    return
  }
  func.func @transform_0(%arg0: i32) -> (i32, i32, i32) {
    %c0_i32 = arith.constant 0 : i32
    %c0_i32_0 = arith.constant 0 : i32
    %c0_i32_1 = arith.constant 0 : i32
    return %arg0, %c0_i32, %c0_i32_0 : i32, i32, i32
  }
  func.func @transform_1(%arg0: i32) -> (i32, i32) {
    %c0_i32 = arith.constant 0 : i32
    %c0_i32_0 = arith.constant 0 : i32
    %c0_i32_1 = arith.constant 0 : i32
    return %c0_i32, %c0_i32_0 : i32, i32
  }
  func.func @transform_2(%arg0: i32) -> (i32, i32) {
    %c0_i32 = arith.constant 0 : i32
    %c0_i32_0 = arith.constant 0 : i32
    %c0_i32_1 = arith.constant 0 : i32
    return %c0_i32, %c0_i32_0 : i32, i32
  }
  func.func @transform_3(%arg0: i32) -> (i32, i32) {
    %c0_i32 = arith.constant 0 : i32
    %c0_i32_0 = arith.constant 0 : i32
    %c0_i32_1 = arith.constant 0 : i32
    return %c0_i32, %c0_i32_0 : i32, i32
  }
  func.func @transform_4(%arg0: i32) -> (i32, i32) {
    %c0_i32 = arith.constant 0 : i32
    %c0_i32_0 = arith.constant 0 : i32
    %c0_i32_1 = arith.constant 0 : i32
    return %c0_i32, %c0_i32_0 : i32, i32
  }
  func.func @transform_5(%arg0: i32) -> (i32, i32, i32) {
    %c0_i32 = arith.constant 0 : i32
    %c0_i32_0 = arith.constant 0 : i32
    %c0_i32_1 = arith.constant 0 : i32
    return %arg0, %c0_i32, %c0_i32_0 : i32, i32, i32
  }
}

</mosaic_0001>

<bundles_post_ra>
// kernel: tpu_custom_call.1
= control target key start
LH: loop header
LB: loop body
LE: loop exit
PB: predicated region body
PF: predicated region fallthrough
CT: control target
= control target key end

     0   :  { %10 = vsyncpa [#allocation5], 0  ;;  %s1321_s0 = inlined_call_operand.hbm [shape: f32[2,4,256], index: 0, kind: input, shape index: {}]   ;;  %s1322_s1 = inlined_call_operand.vmem [shape: f32[4,256], index: 1, kind: input, shape index: {}]   ;;  %s1323_s2 = inlined_call_operand.vmem [shape: f32[4,256], index: 2, kind: input, shape index: {}]   ;;  %s1324_s3 = inlined_call_operand.hbm [shape: f32[8,36], index: 3, kind: input, shape index: {}]   ;;  %s1325_s4 = inlined_call_operand.vmem [shape: f32[8,1], index: 4, kind: input, shape index: {}]   ;;  %s1326_s5 = inlined_call_operand.hbm [shape: f32[2,8,256], index: 5, kind: output, shape index: {}]  }
   0x1   :  { %12 = vsyncpa [#allocation5 + $0x1], 0 }
   0x2   :  { %13 = vsyncpa [#allocation8], 0 }
   0x3   :  { %14 = vsyncpa [#allocation6], 0 }
   0x4   :  { %16 = vsyncpa [#allocation6 + $0x1], 0  ;;  %s1034_s18 = smov 0   ;;  %s1036_s19 = smov 0  }
   0x5   :  { %s1038_s20 = smov 0   ;;  %s1040_s21 = smov 0  }
   0x6 LB: > { %s1055_s22 = sadd.s32 4294967295, %s988_s21   ;;  %s741_s23 = sadd.s32 4294967294, %s988_s21   ;;  %s988_s21 = sphi %s1040_s21, %s1358_s21   ;;  %s984_s20 = sphi %s1038_s20, %s1357_s20   ;;  %s980_s19 = sphi %s1036_s19, %s1356_s19   ;;  %s976_s18 = sphi %s1034_s18, %s1355_s18  }
   0x7   : > { %p42_p0 = scmp.ne.s32.totalorder %s980_s19, %s976_s18  ;;  %p1327_p1 = scmp.eq.s32.totalorder %s1055_s22, 0 }
   0x8   : > { %p156_p3 = scmp.eq.s32.totalorder %s741_s23, 1  ;;  %p742_p5 = scmp.ge.s32.totalorder %s988_s21, 1 }
   0x9   : > { %p1064_p4 = por %p1327_p1, %p42_p0  ;;  %p163_p7 = scmp.lt.s32.totalorder %s988_s21, 3 }
   0xa   : > { %p1069_p6 = por %p156_p3, %p42_p0  ;;  %s990_s27 = smov [#allocation7]  }
   0xb   : > { %s1330_s24 = scalar_select %p1064_p4, 1, 0 }
   0xc   : > { %s1331_s25 = scalar_select %p1069_p6, 1, 0 }
   0xd   : > { %p1074_p8 = pnand %p742_p5, %p163_p7  ;;  %s182_s28 = sshll.u32 %s990_s27, 4  ;;  %s183_s28 = int_to_ptr.vmem [resolvable:$true] %s182_s28 }
   0xe   : > { %s1082_s29 = sadd.s32 1, %s988_s21   ;;  %s29_s8 = sadd.s32 1, %s984_s20 }
   0xf   : > { %s1332_s26 = scalar_select %p1074_p8, 1, 0 }
  0x10   : > { %p784_p10 = pneg %p1074_p8  ;;  %s26_s6 = ssub.s32 %s988_s21, %s1082_s29 }
  0x11   : > { %p1092_p12 = scmp.eq.s32.totalorder %s26_s6, 0  ;;  %s860_s11 = scalar_lea.hbm %s1324_s3, 128 }
  0x12   : > { %p1086_p11 = pnand %p784_p10, %p1327_p1  ;;  %p861_p0 = scmp.ne.s32.totalorder %s1324_s3, %s860_s11 }
  0x13   : > { %s1334_s7 = scalar_select %p1092_p12, 1, 0 }
  0x14   : > { %p862_p3 = pneg %p1086_p11  ;;  %p867_p10 = scmp.lt.u32.totalorder %s860_s11, %s1324_s3 }
  0x16   : > { %p863_p5 = pnand %p862_p3, %p861_p0 }
  0x18   : > { %p864_p7 = pneg %p863_p5 }
  0x1a   : > { %p869_p9 = pnand %p867_p10, %p864_p7 }
  0x1c   : > { %872 = shalt.err (!%p869_p9)
}
  0x1d   : > { %s873_s16 = scalar_lea.vmem %s183_s28, 128  ;;  %p881_p6 = scmp.lt.s32.totalorder %s183_s28, %s183_s28 }
  0x1e   : > { %p874_p1 = scmp.ne.s32.totalorder %s183_s28, %s873_s16  ;;  %p882_p4 = scmp.lt.s32.totalorder %s873_s16, %s873_s16 }
  0x20   : > { %p876_p2 = pnand %p874_p1, %p862_p3  ;;  %p883_p8 = por %p882_p4, %p881_p6 }
  0x22   : > { %p877_p13 = pneg %p876_p2 }
  0x24   : > { %p884_p12 = pnand %p883_p8, %p877_p13 }
  0x26   : > { %887 = shalt.err (!%p884_p12)
}
  0x27   : > { %787 = dma.hbm_to_vmem [thread:$0]  (!%p1086_p11), %s1324_s3, 128, %s183_s28, [#allocation8]  }
  0x28   : > { %p1335_p1 = scmp.ne.s32.totalorder %s1334_s7, 0  ;;  %p37_p2 = scmp.eq.s32.totalorder %s988_s21, 0 }
  0x29   : > { %p1336_p4 = scmp.ne.s32.totalorder %s984_s20, %s980_s19  ;;  %p1337_p6 = scmp.eq.s32.totalorder %s1055_s22, 1 }
  0x2a   : > { %s1118_s27 = scalar_select %p1335_p1, %s984_s20, %s29_s8  }
  0x2b   : > { %p1126_p8 = por %p1337_p6, %p1336_p4  ;;  %p797_p9 = scmp.lt.s32.totalorder %s988_s21, 2 }
  0x2c   : > { %s196_s6 = sand.u32 1, %s984_s20   ;;  %p1339_p12 = pmov %p1336_p4 }
  0x2d   : > { %s745_s9 = sshll.u32 %s196_s6, 3  ;;  %s762_s10 = sshll.u32 %s988_s21, 7 }
  0x2e   : > { %p38_p13 = por %p37_p2, %p1339_p12  ;;  %s1139_s28 = scalar_lea.hbm %s1321_s0, %s762_s10 }
  0x2f   : > { %s200_s7 = scalar_lea.vmem [#allocation4], %s745_s9  ;;  %s197_s14 = scalar_lea.sflag [#allocation5], %s196_s6 }
  0x30   : > { %s208_s8 = sshll.u32 %s200_s7, 4  ;;  %p1141_p11 = pnand %p797_p9, %p38_p13  ;;  %s1145_s8 = int_to_ptr.vmem [resolvable:$true] %s208_s8 }
  0x31   : > { %s888_s15 = scalar_lea.hbm %s1139_s28, 128  ;;  %s893_s23 = scalar_lea.hbm %s1321_s0, 256 }
  0x32   : > { %p889_p0 = scmp.ne.s32.totalorder %s1139_s28, %s888_s15  ;;  %p890_p3 = pneg %p1141_p11 }
  0x33   : > { %p894_p10 = scmp.lt.u32.totalorder %s1139_s28, %s1321_s0  ;;  %p895_p1 = scmp.lt.u32.totalorder %s893_s23, %s888_s15 }
  0x34   : > { %p891_p5 = pnand %p890_p3, %p889_p0  ;;  %p897_p4 = scmp.lt.u32.totalorder %s888_s15, %s1139_s28 }
  0x35   : > { %p896_p2 = por %p895_p1, %p894_p10 }
  0x36   : > { %p892_p7 = pneg %p891_p5 }
  0x37   : > { %p898_p6 = por %p897_p4, %p896_p2 }
  0x39   : > { %p899_p9 = pnand %p898_p6, %p892_p7 }
  0x3b   : > { %902 = shalt.err (!%p899_p9)
}
  0x3c   : > { %s903_s6 = scalar_lea.vmem %s1145_s8, 128  ;;  %s991_s11 = smov [#allocation4]  }
  0x3d   : > { %p904_p12 = scmp.ne.s32.totalorder %s1145_s8, %s903_s6  ;;  %s908_s12 = sshll.u32 %s991_s11, 4  ;;  %s909_s12 = int_to_ptr.vmem [resolvable:$false] %s908_s12 }
  0x3e   : > { %s910_s7 = scalar_lea.vmem %s909_s12, 256  ;;  %p911_p5 = scmp.lt.s32.totalorder %s1145_s8, %s909_s12 }
  0x3f   : > { %p906_p13 = pnand %p904_p12, %p890_p3  ;;  %p912_p10 = scmp.lt.s32.totalorder %s910_s7, %s903_s6 }
  0x41   : > { %p907_p0 = pneg %p906_p13  ;;  %p913_p1 = por %p912_p10, %p911_p5 }
  0x43   : > { %p914_p2 = pnand %p913_p1, %p907_p0 }
  0x45   : > { %917 = shalt.err (!%p914_p2)
}
  0x46   : > { %791 = dma.hbm_to_vmem [thread:$0]  (!%p1141_p11), %s1139_s28, 128, %s1145_s8, %s197_s14  }
  0x47   : > { %p1341_p7 = scmp.ne.s32.totalorder %s1332_s26, 0 }
  0x48   : > { %s1175_s15 = sand.u32 (!%p1341_p7), 1, %s980_s19   ;;  %p1342_p3 = scmp.ne.s32.totalorder (!%p1341_p7), %s1330_s24, 0 }
  0x49   : > { %217 = sbr.rel (%p1341_p7) target bundleno = 1097 (0x449), region = 40  ;;  %s749_s16 = sshll.u32 (!%p1341_p7), %s1175_s15, 3 }
  0x4a   : > { %s220_s17 = scalar_lea.sflag (!%p1341_p7), [#allocation5], %s1175_s15  ;;  %s223_s23 = scalar_lea.vmem (!%p1341_p7), [#allocation4], %s749_s16 }
  0x50   : > { %963 = dma.done.wait (%p1342_p3), %s220_s17, 128  }
  0x51   : > { %965 = vsyncadd (%p1342_p3), %s220_s17, 4294967168  ;;  %p1343_p4 = scmp.eq.s32.totalorder %s1055_s22, 0 }
  0x53   : > { %967 = dma.done.wait (%p1343_p4), [#allocation8], 128   ;;  %p1344_p11 = pmov %p1343_p4 }
  0x54   : > { %vm258_vm0 = vcmask 1043456   ;;  %v254_v0 = vld [vmem:[%s223_s23] sm:$0xff]  ;;  %vm301_vm1 = vcmask 273408   ;;  %v992_v20 = vmov 0.0   ;;  %s993_s9 = smov 17   ;;  %v317_v37 = vlaneseq  ;;  %s994_s10 = smov 112  }
  0x55   : > { %969 = vsyncadd (%p1344_p11), [#allocation8], 4294967168  ;;  %v256_v1 = vcombine.high %v254_v0, %v254_v0  ;;  %v259_v2 = vsel %vm258_vm0, %v254_v0, 0.0  ;;  %300 = vst [vmem:[#allocation2] sm:$0xff] %v992_v20  ;;  %623 = vmatprep.mubr.f32.mxu0 %v992_v20  ;;  %v296_v32 = vld [vmem:[%s1322_s1] sm:$0xff]  ;;  %vm311_vm2 = vcmask 1043592  }
  0x56   : > { %302 = vst.msk [vmem:[#allocation2 + $0x8] sm:$0xf] %vm301_vm1, %v992_v20  ;;  %v298_v34 = vld [vmem:[%s1323_s2] sm:$0xff]  ;;  %vm312_vm3 = vcmask 1047556   ;;  %v1197_v38 = vand.u32 127, %v317_v37  ;;  %vm307_vm4 = vcmask 138240  }
  0x57   : > { %v260_v3 = vsel %vm258_vm0, %v256_v1, 0.0  ;;  %vm315_vm5 = vcmask 134144   ;;  %vm313_vm6 = vmor %vm312_vm3, %vm311_vm2  ;;  %s995_s6 = smov 126   ;;  %s996_s11 = smov 110   ;;  %v543_v60 = vld [vmem:[%s1325_s4] sm:$0xff]  ;;  %v1002_v61 = vmov 0  }
  0x58   : > { %v261_v4 = vadd.f32 %v260_v3, %v259_v2  ;;  %v1200_v42 = vadd.s32 128, %v1197_v38  ;;  %v324_v43 = vand.u32 15, %v1197_v38  ;;  %s997_s12 = smov 96   ;;  %s998_s7 = smov 111   ;;  %844 = vset.pattern.permute.xlu0 %v1002_v61  ;;  %vm372_vm9 = vcmask 1039360  }
  0x59   : > { %s999_s16 = smov 95   ;;  %s1000_s17 = smov 127   ;;  %vm484_vm10 = vcmask 785408   ;;  %vm440_vm11 = vcmask 908288   ;;  %vm505_vm12 = vcmask 777216   ;;  %vm414_vm13 = vcmask 916480  }
  0x5a   : > { %262 = vadd.xlane.f32.xlu0 %v261_v4  ;;  %v331_v44 = vand.u32 15, %v1200_v42  ;;  %vm1206_vm7 = vcmp.ge.s32.totalorder %v324_v43, 1  ;;  %s1001_s23 = smov 94   ;;  %vm394_vm14 = vcmask 1031168   ;;  %vm1245_vm15 = vcmp.le.s32.totalorder %v324_v43, 14  ;;  %s751_s28 = sshll.u32 %s1175_s15, 4 }
  0x5b   : > { %vm458_vm2 = vcmask 900096   ;;  %vm523_vm3 = vcmask 769024   ;;  %s763_s8 = sshll.u32 %s1055_s22, 8  ;;  %s253_s13 = scalar_lea.vmem [#allocation9], %s751_s28 }
  0x5c   : > { %vm1214_vm8 = vcmp.ge.s32.totalorder %v331_v44, 1  ;;  %vm1251_vm1 = vcmp.le.s32.totalorder %v331_v44, 14  ;;  %s661_s14 = sshll.u32 %s253_s13, 4  ;;  %s1279_s14 = int_to_ptr.vmem [resolvable:$true] %s661_s14 }
  0x5d   : > { %s918_s22 = scalar_lea.vmem %s1279_s14, 256 }
  0x5e   : > { %p919_p6 = scmp.ne.s32.totalorder %s1279_s14, %s918_s22 }
  0x60   : > { %p920_p9 = pnand %p919_p6, %p1126_p8 }
  0x62   : > { %p921_p12 = pneg %p920_p9 }
  0xe7   : > { %v263_v5 = vpop.xlane.xlu0 %262 }
  0xe8   : > { %v264_v6 = vrot.slane %v263_v5, 4 }
  0xea   : > { %v265_v7 = vadd.f32 %v264_v6, %v263_v5 }
  0xec   : > { %v266_v8 = vrot.slane %v265_v7, 2 }
  0xee   : > { %v267_v9 = vadd.f32 %v266_v8, %v265_v7 }
  0xf0   : > { %v268_v10 = vrot.slane %v267_v9, 1 }
  0xf2   : > { %v269_v11 = vadd.f32 %v268_v10, %v267_v9 }
  0xf4   : > { %772 = vpush %v269_v11 }
 0x125   : > { %s773_s24 = spop %772 }
 0x126   : > { %v271_v12 = vstv %s773_s24 }
 0x127   : > { %v273_v13 = vmul.f32 0.0009765625, %v271_v12 }
 0x129   : > { %v274_v14 = vsub.f32 %v254_v0, %v273_v13 }
 0x12b   : > { %v275_v15 = vmul.f32 %v274_v14, %v274_v14 }
 0x12d   : > { %v277_v16 = vcombine.high %v275_v15, %v275_v15  ;;  %v279_v17 = vsel %vm258_vm0, %v275_v15, 0.0 }
 0x12f   : > { %v280_v18 = vsel %vm258_vm0, %v277_v16, 0.0 }
 0x130   : > { %v281_v19 = vadd.f32 %v280_v18, %v279_v17 }
 0x132   : > { %282 = vadd.xlane.f32.xlu0 %v281_v19 }
 0x1bf   : > { %v283_v21 = vpop.xlane.xlu0 %282 }
 0x1c0   : > { %v284_v22 = vrot.slane %v283_v21, 4 }
 0x1c2   : > { %v285_v23 = vadd.f32 %v284_v22, %v283_v21 }
 0x1c4   : > { %v286_v24 = vrot.slane %v285_v23, 2 }
 0x1c6   : > { %v287_v25 = vadd.f32 %v286_v24, %v285_v23 }
 0x1c8   : > { %v288_v26 = vrot.slane %v287_v25, 1 }
 0x1ca   : > { %v289_v27 = vadd.f32 %v288_v26, %v287_v25 }
 0x1cc   : > { %774 = vpush %v289_v27 }
 0x1fd   : > { %s775_s26 = spop %774 }
 0x1fe   : > { %v291_v28 = vstv %s775_s26 }
 0x1ff   : > { %v292_v29 = vmul.f32 0.0009765625, %v291_v28 }
 0x201   : > { %v293_v30 = vadd.f32 1e-05, %v292_v29 }
 0x203   : > { %850 = vrsqrt.f32 %v293_v30 }
 0x20d   : > { %v851_v31 = vpop.eup %850 }
 0x20e   : > { %v295_v33 = vmul.f32 %v851_v31, %v274_v14 }
 0x210   : > { %v297_v35 = vmul.f32 %v296_v32, %v295_v33 }
 0x212   : > { %v299_v36 = vadd.f32 %v298_v34, %v297_v35 }
 0x214   : > { %304 = vrot.lane.b32.xlu1 %v299_v36, %s993_s9 }
 0x286   : > { %v305_v39 = vpop.permute.xlu1 %304 }
 0x287   : > { %v306_v40 = vrot.slane %v305_v39, 4 }
 0x289   : > { %v308_v41 = vsel %vm307_vm4, %v306_v40, %v305_v39  ;;  %316 = vst.msk [vmem:[#allocation2 + $0x8] sm:$0xf] %vm315_vm5, %v306_v40  ;;  %vm549_vm4 = vcmask 293888  }
 0x28a   : > { %314 = vst.msk [vmem:[#allocation2] sm:$0xff] %vm313_vm6, %v308_v41 }
 0x290   : > { %v404_v45 = vld [vmem:[#allocation2 + $0x8] sm:$0xf] }
 0x291   : > { %v380_v46 = vld [vmem:[#allocation2 + $0x8] sm:$0xf]  ;;  %412 = vrot.lane.b32.xlu0 %v404_v45, %s994_s10  ;;  %v473_v48 = vld [vmem:[#allocation2] sm:$0xff] }
 0x292   : > { %392 = vrot.lane.b32.xlu1 %v380_v46, %s995_s6  ;;  %v477_v50 = vcombine.high %v473_v48, %v473_v48  ;;  %v356_v51 = vsel %vm1206_vm7, %v473_v48, 0.0  ;;  %v448_v52 = vld [vmem:[#allocation2 + $0x8] sm:$0xf]  ;;  %v364_v57 = vcombine.low %v473_v48, %v473_v48 }
 0x293   : > { %v474_v53 = vld [vmem:[#allocation2 + $0x8] sm:$0xf]  ;;  %358 = vst [vmem:[#allocation3] sm:$0xf] %v356_v51 }
 0x294   : > { %v357_v54 = vsel %vm1214_vm8, %v477_v50, 0.0  ;;  %v430_v55 = vld [vmem:[#allocation2 + $0x8] sm:$0xf] }
 0x295   : > { %456 = vrot.lane.b32.xlu0 %v448_v52, %s996_s11  ;;  %359 = vst [vmem:[#allocation3 + $0x8] sm:$0xf] %v357_v54  ;;  %v847_v56 = vld [vmem:[#allocation2 + $0x8] ss:$0 sps:$4 sm:$0xff]  }
 0x296   : > { %482 = vrot.lane.b32.xlu1 %v474_v53, %s997_s12  ;;  %v849_v58 = vld [vmem:[#allocation2 + $0x8] ss:$0 sps:$4 sm:$0xff]  }
 0x297   : > { %v513_v59 = vld [vmem:[#allocation2 + $0x8] sm:$0xf] }
 0x299   : > { %478 = vrot.lane.b32.xlu0 %v473_v48, %s997_s12 }
 0x29a   : > { %438 = vrot.lane.b32.xlu1 %v430_v55, %s998_s7 }
 0x29d   : > { %503 = vrot.lane.b32.xlu0 %v847_v56, %s999_s16 }
 0x29e   : > { %408 = vrot.lane.b32.xlu1 %v473_v48, %s994_s10 }
 0x2a1   : > { %366 = vrot.lane.b32.xlu0 %v364_v57, %s1000_s17 }
 0x2a2   : > { %368 = vrot.lane.b32.xlu1 %v473_v48, %s1000_s17 }
 0x2a5   : > { %480 = vrot.lane.b32.xlu0 %v477_v50, %s997_s12  ;;  %s1003_s12 = smov [#allocation9]  }
 0x2a6   : > { %388 = vrot.lane.b32.xlu1 %v473_v48, %s995_s6 }
 0x2a9   : > { %436 = vrot.lane.b32.xlu0 %v477_v50, %s998_s7 }
 0x2aa   : > { %452 = vrot.lane.b32.xlu1 %v473_v48, %s996_s11 }
 0x2ad   : > { %499 = vrot.lane.b32.xlu0 %v364_v57, %s999_s16 }
 0x2ae   : > { %501 = vrot.lane.b32.xlu1 %v473_v48, %s999_s16 }
 0x2b1   : > { %521 = vrot.lane.b32.xlu0 %v513_v59, %s1001_s23 }
 0x2b2   : > { %370 = vrot.lane.b32.xlu1 %v849_v58, %s1000_s17 }
 0x2b5   : > { %546 = vperm.xlu0 %844, %v543_v60  }
 0x2b6   : > { %410 = vrot.lane.b32.xlu1 %v477_v50, %s994_s10 }
 0x2ba   : > { %390 = vrot.lane.b32.xlu1 %v477_v50, %s995_s6  ;;  %s1277_s6 = scalar_lea.hbm %s1326_s5, %s763_s8 }
 0x2be   : > { %454 = vrot.lane.b32.xlu1 %v477_v50, %s996_s11  ;;  %s647_s11 = scalar_lea.sflag [#allocation6], %s1175_s15 }
 0x2c2   : > { %434 = vrot.lane.b32.xlu1 %v473_v48, %s998_s7  ;;  %s922_s7 = sshll.u32 %s1003_s12, 4  ;;  %s923_s7 = int_to_ptr.vmem [resolvable:$false] %s922_s7 }
 0x2c3   : > { %s924_s16 = scalar_lea.vmem %s923_s7, 512  ;;  %p925_p13 = scmp.lt.s32.totalorder %s1279_s14, %s923_s7 }
 0x2c4   : > { %p926_p0 = scmp.lt.s32.totalorder %s924_s16, %s918_s22 }
 0x2c6   : > { %519 = vrot.lane.b32.xlu1 %v477_v50, %s1001_s23  ;;  %p927_p5 = por %p926_p0, %p925_p13 }
 0x2c8   : > { %p928_p10 = pnand %p927_p5, %p921_p12 }
 0x2ca   : > { %517 = vrot.lane.b32.xlu1 %v473_v48, %s1001_s23 }
 0x303   : > { %v413_v62 = vpop.permute.xlu0 %412 }
 0x304   : > { %v393_v63 = vpop.permute.xlu1 %392 }
 0x307   : > { %v457_v0 = vpop.permute.xlu0 %456 }
 0x308   : > { %v483_v1 = vpop.permute.xlu1 %482 }
 0x30b   : > { %v479_v3 = vpop.permute.xlu0 %478 }
 0x30c   : > { %v439_v2 = vpop.permute.xlu1 %438 }
 0x30f   : > { %v504_v4 = vpop.permute.xlu0 %503 }
 0x310   : > { %v409_v5 = vpop.permute.xlu1 %408 }
 0x313   : > { %v367_v7 = vpop.permute.xlu0 %366 }
 0x314   : > { %v369_v6 = vpop.permute.xlu1 %368 }
 0x315   : > { %v373_v8 = vsel %vm372_vm9, %v367_v7, %v369_v6 }
 0x316   : > { %377 = vst [vmem:[#allocation3] sm:$0xf0] %v373_v8 }
 0x317   : > { %v481_v10 = vpop.permute.xlu0 %480 }
 0x318   : > { %v389_v9 = vpop.permute.xlu1 %388  ;;  %v485_v11 = vsel %vm484_vm10, %v479_v3, %v481_v10  ;;  %v486_v12 = vsel %vm484_vm10, %v481_v10, %v483_v1  ;;  %v532_v3 = vld [vmem:[#allocation7] sm:$0xff] }
 0x319   : > { %v489_v13 = vsel %vm1206_vm7, %v485_v11, 0.0  ;;  %v490_v14 = vsel %vm1214_vm8, %v486_v12, 0.0 }
 0x31a   : > { %491 = vst [vmem:[#allocation3 + $0x30] sm:$0xf] %v489_v13  ;;  %492 = vst [vmem:[#allocation3 + $0x38] sm:$0xf] %v490_v14 }
 0x31b   : > { %v437_v16 = vpop.permute.xlu0 %436 }
 0x31c   : > { %v453_v15 = vpop.permute.xlu1 %452  ;;  %v442_v17 = vsel %vm440_vm11, %v437_v16, %v439_v2 }
 0x31d   : > { %446 = vst [vmem:[#allocation3 + $0x28] sm:$0xf] %v442_v17  ;;  %v533_v47 = vld [vmem:[#allocation3] sm:$0xff] }
 0x31f   : > { %v500_v19 = vpop.permute.xlu0 %499 }
 0x320   : > { %v502_v18 = vpop.permute.xlu1 %501 }
 0x321   : > { %v507_v20 = vsel %vm505_vm12, %v502_v18, %v504_v4  ;;  %v506_v21 = vsel %vm505_vm12, %v500_v19, %v502_v18 }
 0x322   : > { %511 = vst [vmem:[#allocation3 + $0x38] sm:$0xf0] %v507_v20  ;;  %510 = vst [vmem:[#allocation3 + $0x30] sm:$0xf0] %v506_v21 }
 0x323   : > { %v522_v53 = vpop.permute.xlu0 %521 }
 0x324   : > { %v371_v22 = vpop.permute.xlu1 %370 }
 0x325   : > { %v374_v23 = vsel %vm372_vm9, %v369_v6, %v371_v22 }
 0x326   : > { %378 = vst [vmem:[#allocation3 + $0x8] sm:$0xf0] %v374_v23 }
 0x328   : > { %v411_v24 = vpop.permute.xlu1 %410 }
 0x329   : > { %v415_v25 = vsel %vm414_vm13, %v409_v5, %v411_v24  ;;  %v416_v26 = vsel %vm414_vm13, %v411_v24, %v413_v62  ;;  %v540_v59 = vld [vmem:[#allocation3 + $0x38] sm:$0xff] }
 0x32a   : > { %v419_v27 = vsel %vm1206_vm7, %v415_v25, 0.0  ;;  %v420_v28 = vsel %vm1214_vm8, %v416_v26, 0.0 }
 0x32b   : > { %v423_v29 = vrot.slane %v419_v27, 4  ;;  %v424_v30 = vrot.slane %v420_v28, 4 }
 0x32c   : > { %v391_v33 = vpop.permute.xlu1 %390 }
 0x32d   : > { %427 = vst [vmem:[#allocation3 + $0x10] sm:$0xf0] %v423_v29  ;;  %428 = vst [vmem:[#allocation3 + $0x18] sm:$0xf0] %v424_v30  ;;  %v395_v34 = vsel %vm394_vm14, %v389_v9, %v391_v33  ;;  %v396_v35 = vsel %vm394_vm14, %v391_v33, %v393_v63  ;;  %v534_v48 = vld [vmem:[#allocation3 + $0x8] sm:$0xff]  ;;  %v539_v63 = vld [vmem:[#allocation3 + $0x30] sm:$0xff] }
 0x32e   : > { %v399_v36 = vsel %vm1245_vm15, %v395_v34, 0.0  ;;  %v400_v37 = vsel %vm1251_vm1, %v396_v35, 0.0 }
 0x32f   : > { %401 = vst [vmem:[#allocation3 + $0x10] sm:$0xf] %v399_v36  ;;  %402 = vst [vmem:[#allocation3 + $0x18] sm:$0xf] %v400_v37 }
 0x330   : > { %v455_v38 = vpop.permute.xlu1 %454 }
 0x331   : > { %v459_v39 = vsel %vm458_vm2, %v453_v15, %v455_v38  ;;  %v460_v40 = vsel %vm458_vm2, %v455_v38, %v457_v0 }
 0x332   : > { %v463_v41 = vsel %vm1245_vm15, %v459_v39, 0.0  ;;  %v464_v42 = vsel %vm1251_vm1, %v460_v40, 0.0 }
 0x333   : > { %v467_v43 = vrot.slane %v463_v41, 4  ;;  %v468_v44 = vrot.slane %v464_v42, 4 }
 0x334   : > { %v435_v45 = vpop.permute.xlu1 %434  ;;  %v547_v5 = vpop.permute.xlu0 %546 }
 0x335   : > { %471 = vst [vmem:[#allocation3 + $0x20] sm:$0xf0] %v467_v43  ;;  %472 = vst [vmem:[#allocation3 + $0x28] sm:$0xf0] %v468_v44  ;;  %v441_v46 = vsel %vm440_vm11, %v435_v45, %v437_v16 }
 0x336   : > { %445 = vst [vmem:[#allocation3 + $0x20] sm:$0xf] %v441_v46  ;;  %v536_v49 = vld [vmem:[#allocation3 + $0x18] sm:$0xff]  ;;  %v535_v50 = vld [vmem:[#allocation3 + $0x10] sm:$0xff] }
 0x337   : > { %v764_v51 = vpack.c.bf16 %v536_v49, %v534_v48  ;;  %v766_v52 = vpack.c.bf16 %v535_v50, %v533_v47 }
 0x338   : > { %v520_v54 = vpop.permute.xlu1 %519 }
 0x339   : > { %v525_v55 = vsel %vm523_vm3, %v520_v54, %v522_v53  ;;  %765 = vmatprep.subr.bf16.mxu0 %v764_v51 }
 0x33a   : > { %v529_v56 = vsel %vm1251_vm1, %v525_v55, 0.0  ;;  %767 = vmatpush1.bf16.msra.mxu0 %v766_v52 }
 0x33b   : > { %531 = vst [vmem:[#allocation3 + $0x48] sm:$0xf] %v529_v56 }
 0x33c   : > { %v518_v57 = vpop.permute.xlu1 %517  ;;  %v538_v58 = vld [vmem:[#allocation3 + $0x28] sm:$0xff] }
 0x33d   : > { %v524_v60 = vsel %vm523_vm3, %v518_v57, %v520_v54  ;;  %v768_v61 = vpack.c.bf16 %v540_v59, %v538_v58  ;;  %v537_v62 = vld [vmem:[#allocation3 + $0x20] sm:$0xff] }
 0x33e   : > { %v528_v0 = vsel %vm1245_vm15, %v524_v60, 0.0  ;;  %v770_v1 = vpack.c.bf16 %v539_v63, %v537_v62 }
 0x33f   : > { %530 = vst [vmem:[#allocation3 + $0x40] sm:$0xf] %v528_v0  ;;  %769 = vmatprep.subr.bf16.mxu0 %v768_v61 }
 0x340   : > { %771 = vmatpush1.bf16.msra.mxu0 %v770_v1 }
 0x342   : > { %v542_v2 = vld [vmem:[#allocation3 + $0x48] sm:$0xf] }
 0x343   : > { %752 = vmatprep.subr.msk.mxu0 %vm258_vm0, %v542_v2 }
 0x346   : > { %v541_v4 = vld [vmem:[#allocation3 + $0x40] sm:$0xf] }
 0x347   : > { %753 = vmatpush1.msk.msra.mxu0 %vm258_vm0, %v541_v4 }
 0x348   : > { %754 = vmatmul.mubr.msk.f32.vlgmr.msra.gmra.mrb[0].mxu0 %vm549_vm4, %v532_v3 }
 0x41b   : > { %v625_v6 = vpop.f32.mrb[0].mxu0 }
 0x41c   : > { %v626_v7 = vadd.f32 %v625_v6, %v547_v5  ;;  %v627_v8 = vpop.f32.mrb[1].mxu0 }
 0x41d   : > { %v628_v9 = vadd.f32 %v627_v8, %v547_v5 }
 0x41e   : > { %v755_v10 = vmul.f32 -1.442695, %v626_v7 }
 0x41f   : > { %v756_v11 = vmul.f32 -1.442695, %v628_v9 }
 0x420   : > { %852 = vpow2.f32 %v755_v10 }
 0x421   : > { %854 = vpow2.f32 %v756_v11 }
 0x42a   : > { %v853_v12 = vpop.eup %852 }
 0x42b   : > { %v855_v13 = vpop.eup %854  ;;  %v636_v14 = vadd.f32 1.0, %v853_v12 }
 0x42c   : > { %v637_v15 = vadd.f32 1.0, %v855_v13 }
 0x42d   : > { %856 = vrcp.f32 %v636_v14 }
 0x42e   : > { %858 = vrcp.f32 %v637_v15 }
 0x437   : > { %v857_v16 = vpop.eup %856 }
 0x438   : > { %v859_v17 = vpop.eup %858  ;;  %v642_v18 = vmul.f32 %v857_v16, %v626_v7 }
 0x439   : > { %v643_v19 = vmul.f32 %v859_v17, %v628_v9 }
 0x43a   : > { %644 = vst [vmem:[%s253_s13] sm:$0xff] %v642_v18 }
 0x43b   : > { %645 = vst [vmem:[%s253_s13 + $0x8] sm:$0xff] %v643_v19 }
 0x43c   : > { %931 = shalt.err (!%p928_p10)
}
 0x43d   : > { %s932_s15 = scalar_lea.hbm %s1277_s6, 256  ;;  %s936_s24 = scalar_lea.hbm %s1326_s5, 512 }
 0x43e   : > { %p933_p1 = scmp.ne.s32.totalorder %s1277_s6, %s932_s15  ;;  %p937_p3 = scmp.lt.u32.totalorder %s1277_s6, %s1326_s5 }
 0x43f   : > { %p938_p4 = scmp.lt.u32.totalorder %s936_s24, %s932_s15  ;;  %p940_p6 = scmp.lt.u32.totalorder %s932_s15, %s1277_s6 }
 0x440   : > { %p934_p2 = pnand %p933_p1, %p1126_p8 }
 0x441   : > { %p939_p11 = por %p938_p4, %p937_p3 }
 0x442   : > { %p935_p7 = pneg %p934_p2 }
 0x443   : > { %p941_p9 = por %p940_p6, %p939_p11 }
 0x445   : > { %p942_p12 = pnand %p941_p9, %p935_p7 }
 0x447   : > { %945 = shalt.err (!%p942_p12)
}
 0x448   : > { %782 = dma.vmem_to_hbm [thread:$0]  (%p1126_p8), %s1279_s14, 256, %s1277_s6, %s647_s11  }
 0x449 PF: > { %s673_s8 = sand.u32 1, %s976_s18   ;;  %p1353_p13 = scmp.ne.s32.totalorder %s1331_s25, 0 }
 0x44a   : > { %p1354_p0 = scmp.ge.s32.totalorder %s988_s21, 2  ;;  %s674_s13 = scalar_lea.sflag [#allocation6], %s673_s8 }
 0x44c   : > { %p793_p5 = pnand %p1354_p0, %p1353_p13 }
 0x44e   : > { %971 = dma.done.wait (!%p793_p5), %s674_s13, 256  }
 0x44f   : > { %973 = vsyncadd (!%p793_p5), %s674_s13, 4294967040  ;;  %p19_p10 = scmp.ge.s32.totalorder %s1082_s29, 4   ;;  %s1355_s18 = smov %s980_s19 }
 0x450   : > { %s1356_s19 = smov %s984_s20  ;;  %s1357_s20 = smov %s1118_s27 }
 0x451   : > { %s1358_s21 = smov %s1082_s29  ;;  %21 = sbr.rel (!%p19_p10) target bundleno = 6 (0x6), region = 89 }
 0x458   :  { %679 = vsyncpa [#allocation5], 1 }
 0x459   :  { %681 = vsyncpa [#allocation5 + $0x1], 1 }
 0x45a   :  { %682 = vsyncpa [#allocation8], 1 }
 0x45b   :  { %683 = vsyncpa [#allocation6], 1 }
 0x45c   :  { %685 = vsyncpa [#allocation6 + $0x1], 1 }

</bundles_post_ra>
